<compile_context>
chip_gen: v6e
topology: v6e:2x2x1
jax: 0.10.0
libtpu: 0.0.40
codegen_flags: <defaults>
</compile_context>

<pallas_src>
import functools

import jax
import jax.numpy as jnp
from jax.experimental import pallas as pl
from jax.experimental.pallas import tpu as pltpu


PARAM_DTYPE = jnp.bfloat16   # MXU operand dtype; accumulation is always f32.


def _round_up(x, m):
    return (x + m - 1) // m * m


def _vmem_budget_bytes():
    """Physical VMEM minus ~15% headroom for compiler internal scratch."""
    try:
        cap = int(pltpu.get_tpu_info().vmem_capacity_bytes)
    except Exception:
        cap = 64 << 20          # conservative (v7x-sized) fallback
    return int(cap * 0.85)


# ----------------------------------------------------------------------------
# Pallas kernels
# ----------------------------------------------------------------------------
def _matmul_bias_kernel(x_ref, w_ref, b_ref, o_ref):
    """o = x @ w + b for one (bm, bn) output tile (full-K dot)."""
    o_ref[...] = (jnp.dot(x_ref[...], w_ref[...],
                          preferred_element_type=jnp.float32)
                  + b_ref[...]).astype(o_ref.dtype)


def _lstm_layer_kernel(xp_ref, whh_ref, out_ref, *, seq_len, hp, num_dirs,
                       last_only):
    """One (bi)directional LSTM layer; both directions interleaved in one body.

    xp_ref:  (S, Bp, num_dirs*4*hp)  precomputed x@W_ih^T + (b_ih + b_hh),
             columns laid out as [fwd gates | bwd gates].
    whh_ref: (num_dirs, hp, 4*hp)    hidden->hidden weights (bf16).
    out_ref: (S or 1, Bp, num_dirs*hp)
    """
    S = seq_len
    B = xp_ref.shape[1]

    # Hoisted: weights stay resident across all steps.
    whh = [whh_ref[d] for d in range(num_dirs)]
    # TODO(synk): keep W_hh stationary in MXU staging registers via
    # pltpu.matmul_push_rhs / matmul_acc_lhs to shave the per-step weight push.

    def cell(pre, h, c, w):
        gates = pre + jnp.dot(h.astype(w.dtype), w,
                              preferred_element_type=jnp.float32)
        # hp == 128 -> every gate slice is whole-vreg / lane-dense.
        i_g = jax.nn.sigmoid(gates[:, 0 * hp:1 * hp])
        f_g = jax.nn.sigmoid(gates[:, 1 * hp:2 * hp])
        g_g = jnp.tanh(gates[:, 2 * hp:3 * hp])
        o_g = jax.nn.sigmoid(gates[:, 3 * hp:4 * hp])
        c_new = f_g * c + i_g * g_g
        h_new = o_g * jnp.tanh(c_new)
        return h_new, c_new

    zeros = jnp.zeros((B, hp), jnp.float32)

    if last_only:
        # Classifier reads lstm_output[:, -1, :] only.
        #   fwd half = state after all S steps.
        #   bwd half = state after processing just token S-1 from zero init
        #              (PyTorch reverse-direction semantics at position S-1),
        #              so the remaining S-1 backward steps are dead compute.
        if num_dirs == 2:
            pre_b = xp_ref[S - 1, :, 4 * hp:8 * hp].astype(jnp.float32)
            h_b, _ = cell(pre_b, zeros, zeros, whh[1])
            out_ref[0, :, hp:2 * hp] = h_b.astype(out_ref.dtype)

        def fwd_step(s, carry):
            h, c = carry
            pre = xp_ref[s, :, 0:4 * hp].astype(jnp.float32)
            return cell(pre, h, c, whh[0])

        h_f, _ = jax.lax.fori_loop(0, S, fwd_step, (zeros, zeros))
        out_ref[0, :, 0:hp] = h_f.astype(out_ref.dtype)
    else:
        def step(s, carry):
            h_f, c_f, h_b, c_b = carry
            # Forward walks t = s.
            pre_f = xp_ref[s, :, 0:4 * hp].astype(jnp.float32)
            h_f, c_f = cell(pre_f, h_f, c_f, whh[0])
            out_ref[s, :, 0:hp] = h_f.astype(out_ref.dtype)
            if num_dirs == 2:
                # Backward walks t = S-1-s (in-kernel reverse, no HBM [::-1]).
                t_b = S - 1 - s
                pre_b = xp_ref[t_b, :, 4 * hp:8 * hp].astype(jnp.float32)
                h_b, c_b = cell(pre_b, h_b, c_b, whh[1])
                out_ref[t_b, :, hp:2 * hp] = h_b.astype(out_ref.dtype)
            return h_f, c_f, h_b, c_b

        jax.lax.fori_loop(0, S, step, (zeros, zeros, zeros, zeros))


# ----------------------------------------------------------------------------
# Pallas wrappers
# ----------------------------------------------------------------------------
def matmul_bias(x, w, b, out_dtype=jnp.float32):
    """(M, K) @ (K, N) + (1, N) -> (M, N), tiled over M and N for the MXU."""
    M, K = x.shape
    N = w.shape[1]
    assert w.shape[0] == K and b.shape == (1, N) and N % 128 == 0
    bn = 256 if N % 256 == 0 else 128          # 256 matches v6e/v7x MXU geometry
    Mp = _round_up(M, 8)
    bm = Mp if Mp <= 512 else 512              # big M tiles: 4x fewer grid steps
    Mp = _round_up(Mp, bm)
    if Mp != M:
        x = jnp.pad(x, ((0, Mp - M), (0, 0)))
    # TODO(synk): for very large K (e.g. BERT-large hidden) add a K grid axis
    # with an f32 accumulator scratch; K here fits a single VMEM block.
    blk = (2 * (bm * K * x.dtype.itemsize
                + K * bn * w.dtype.itemsize
                + bn * b.dtype.itemsize)
           + 2 * bm * bn * jnp.dtype(out_dtype).itemsize)
    vmem = int(min(max(blk + (4 << 20), 32 << 20), _vmem_budget_bytes()))
    out = pl.pallas_call(
        _matmul_bias_kernel,
        out_shape=jax.ShapeDtypeStruct((Mp, N), out_dtype),
        grid=(Mp // bm, N // bn),
        in_specs=[pl.BlockSpec((bm, K), lambda i, j: (i, 0)),
                  pl.BlockSpec((K, bn), lambda i, j: (0, j)),
                  pl.BlockSpec((1, bn), lambda i, j: (0, j))],
        out_specs=pl.BlockSpec((bm, bn), lambda i, j: (i, j)),
        compiler_params=pltpu.CompilerParams(
            dimension_semantics=("parallel", "parallel"),
            vmem_limit_bytes=vmem),
    )(x, w, b)
    return out[:M] if Mp != M else out


def lstm_layer(xp, whh_stack, *, hp, last_only, out_dtype=PARAM_DTYPE):
    """xp: (S, Bp, num_dirs*4*hp) pre-projected inputs; whh_stack: (num_dirs, hp, 4*hp)."""
    S, Bp, _ = xp.shape
    num_dirs = whh_stack.shape[0]
    S_out = 1 if last_only else S
    kernel = functools.partial(_lstm_layer_kernel, seq_len=S, hp=hp,
                               num_dirs=num_dirs, last_only=last_only)
    # TODO(synk): for long sequences / large batches (xp block approaching the
    # VMEM budget) chunk the S axis via memory_space=pl.ANY + a manual
    # double-buffered pltpu.make_async_copy pipeline, and chunk Bp to bound
    # vreg pressure of the (Bp, 4*hp) f32 gates tensor.
    # TODO(synk): on v7x, split the two directions across the two TensorCores
    # with a grid=(2,) + pltpu.CORE_PARALLEL variant of this kernel.
    xp_b = xp.size * xp.dtype.itemsize
    whh_b = whh_stack.size * whh_stack.dtype.itemsize
    out_b = S_out * Bp * num_dirs * hp * jnp.dtype(out_dtype).itemsize
    vmem = int(min(max(2 * (xp_b + whh_b + out_b) + (4 << 20), 32 << 20),
                   _vmem_budget_bytes()))
    return pl.pallas_call(
        kernel,
        out_shape=jax.ShapeDtypeStruct((S_out, Bp, num_dirs * hp), out_dtype),
        grid=(1,),
        in_specs=[pl.BlockSpec((S, Bp, num_dirs * 4 * hp), lambda i: (0, 0, 0)),
                  pl.BlockSpec((num_dirs, hp, 4 * hp), lambda i: (0, 0, 0))],
        out_specs=pl.BlockSpec((S_out, Bp, num_dirs * hp), lambda i: (0, 0, 0)),
        compiler_params=pltpu.CompilerParams(
            dimension_semantics=("arbitrary",),
            vmem_limit_bytes=vmem),
    )(xp, whh_stack)


# ----------------------------------------------------------------------------
# Parameter init (PyTorch layout) + TPU-friendly preparation (pad/transpose/cast)
# ----------------------------------------------------------------------------
def init_params(key, vocab_size, bert_hidden, hidden_size, output_size,
                num_layers, bidirectional=True):
    params = {"bidirectional": bidirectional, "lstm": []}
    num_dirs = 2 if bidirectional else 1
    k_emb, k_lstm, k_fc = jax.random.split(key, 3)

    # Stand-in for the frozen BERT encoder's token representations.
    params["embedding"] = jax.random.normal(
        k_emb, (vocab_size, bert_hidden), jnp.float32) * 0.02

    bound = 1.0 / jnp.sqrt(hidden_size)
    keys = jax.random.split(k_lstm, num_layers * num_dirs * 4)
    ki = 0
    for layer in range(num_layers):
        in_size = bert_hidden if layer == 0 else hidden_size * num_dirs
        layer_params = {}
        for dname in (["fwd", "bwd"] if bidirectional else ["fwd"]):
            w_ih = jax.random.uniform(keys[ki], (4 * hidden_size, in_size),
                                      jnp.float32, -bound, bound)
            w_hh = jax.random.uniform(keys[ki + 1], (4 * hidden_size, hidden_size),
                                      jnp.float32, -bound, bound)
            b_ih = jax.random.uniform(keys[ki + 2], (4 * hidden_size,),
                                      jnp.float32, -bound, bound)
            b_hh = jax.random.uniform(keys[ki + 3], (4 * hidden_size,),
                                      jnp.float32, -bound, bound)
            ki += 4
            layer_params[dname] = (w_ih, w_hh, b_ih, b_hh)
        params["lstm"].append(layer_params)

    fc_in = hidden_size * num_dirs
    fc_bound = 1.0 / jnp.sqrt(fc_in)
    k_fw, k_fb = jax.random.split(k_fc)
    params["fc_w"] = jax.random.uniform(k_fw, (output_size, fc_in),
                                        jnp.float32, -fc_bound, fc_bound)
    params["fc_b"] = jax.random.uniform(k_fb, (output_size,),
                                        jnp.float32, -fc_bound, fc_bound)
    return params


def _pad_gate_cols(w_t, H, Hp):
    """(Din, 4H) -> (Din, 4*Hp): PyTorch gate k (i,f,g,o) placed at [k*Hp : k*Hp+H]."""
    out = jnp.zeros((w_t.shape[0], 4 * Hp), w_t.dtype)
    for k in range(4):
        out = out.at[:, k * Hp:k * Hp + H].set(w_t[:, k * H:(k + 1) * H])
    return out


def _pad_gate_vec(b, H, Hp):
    out = jnp.zeros((4 * Hp,), b.dtype)
    for k in range(4):
        out = out.at[k * Hp:k * Hp + H].set(b[k * H:(k + 1) * H])
    return out


def _pad_rows(w, row_map, rows_p):
    """Scatter input rows into a zero-padded row space (zero padded rows keep
    garbage/padded lanes of the previous layer from leaking into real outputs)."""
    out = jnp.zeros((rows_p, w.shape[1]), w.dtype)
    for src, length, dst in row_map:
        out = out.at[dst:dst + length].set(w[src:src + length])
    return out


def prepare_tpu_params(params, hidden_size):
    """Pad H -> 128-aligned Hp, transpose, fold biases, concat directions, cast bf16."""
    H = hidden_size
    Hp = _round_up(H, 128)
    num_dirs = 2 if params["bidirectional"] else 1

    tp = {"embedding": params["embedding"], "layers": [],
          "num_dirs": num_dirs, "H": H, "Hp": Hp}

    for li, layer in enumerate(params["lstm"]):
        wih_p, whh_p, b_p = [], [], []
        for dname in ["fwd", "bwd"][:num_dirs]:
            w_ih, w_hh, b_ih, b_hh = layer[dname]
            in_size = w_ih.shape[1]
            wih_t = _pad_gate_cols(jnp.transpose(w_ih), H, Hp)       # (in, 4Hp)
            if li == 0:
                row_map, rows_p = [(0, in_size, 0)], in_size
            else:   # input is the previous layer's padded [fwd | bwd] output
                row_map = [(d * H, H, d * Hp) for d in range(num_dirs)]
                rows_p = num_dirs * Hp
            wih_p.append(_pad_rows(wih_t, row_map, rows_p))
            whh_p.append(_pad_rows(_pad_gate_cols(jnp.transpose(w_hh), H, Hp),
                                   [(0, H, 0)], Hp))
            b_p.append(_pad_gate_vec(b_ih + b_hh, H, Hp))
        tp["layers"].append({
            "wih_cat": jnp.concatenate(wih_p, axis=1).astype(PARAM_DTYPE),
            "whh_stack": jnp.stack(whh_p).astype(PARAM_DTYPE),
            "b_cat": jnp.concatenate(b_p).reshape(1, -1).astype(jnp.float32),
        })

    O = params["fc_w"].shape[0]
    Op = _round_up(O, 128)
    fc_row_map = [(d * H, H, d * Hp) for d in range(num_dirs)]
    fc_wt = _pad_rows(jnp.transpose(params["fc_w"]), fc_row_map, num_dirs * Hp)
    tp["fc_w"] = jnp.pad(fc_wt, ((0, 0), (0, Op - O))).astype(PARAM_DTYPE)
    tp["fc_b"] = jnp.pad(params["fc_b"], (0, Op - O)).reshape(1, -1).astype(jnp.float32)
    tp["O"], tp["Op"] = O, Op
    return tp


# ----------------------------------------------------------------------------
# Forward pass (mirrors BertLSTMClassifier.forward)
# ----------------------------------------------------------------------------
def bert_lstm_classifier_forward(tp, input_ids, attention_mask):
    # TODO(synk): the pretrained BERT encoder is an external frozen module with
    # no weights here; its last_hidden_state is emulated by a deterministic
    # embedding lookup gated by attention_mask (JAX glue, not the hot path).
    hidden = jnp.take(tp["embedding"], input_ids, axis=0)            # (B, S, Dbert)
    hidden = hidden * attention_mask[..., None].astype(hidden.dtype)

    B, S, _ = hidden.shape
    hp, num_dirs = tp["Hp"], tp["num_dirs"]
    Bp = _round_up(B, 8)                                             # sublane-align batch

    x = jnp.transpose(hidden, (1, 0, 2))                             # (S, B, D) time-major
    if Bp != B:
        x = jnp.pad(x, ((0, 0), (0, Bp - B), (0, 0)))
    x = x.astype(PARAM_DTYPE)

    num_layers = len(tp["layers"])
    for li, layer in enumerate(tp["layers"]):
        last_only = li == num_layers - 1
        # Hoisted input projection for BOTH directions: one big MXU matmul.
        # TODO(synk): fuse this projection into the recurrence kernel (project
        # the next S-chunk while the recurrence consumes the previous one) to
        # drop the per-layer xp HBM round trip.
        xp = matmul_bias(x.reshape(S * Bp, x.shape[-1]), layer["wih_cat"],
                         layer["b_cat"], out_dtype=PARAM_DTYPE)
        xp = xp.reshape(S, Bp, num_dirs * 4 * hp)
        # Recurrence: only h @ W_hh per step, both directions interleaved.
        x = lstm_layer(xp, layer["whh_stack"], hp=hp, last_only=last_only)

    # nn.Dropout(0.2) is the identity at inference time.
    last = x[0]                                  # == lstm_output[:, -1, :] (padded)
    logits_p = matmul_bias(last, tp["fc_w"], tp["fc_b"], out_dtype=jnp.float32)
    return logits_p[:B, :tp["O"]]


# ----------------------------------------------------------------------------
# Demo
# ----------------------------------------------------------------------------
if __name__ == "__main__":
    key = jax.random.PRNGKey(0)
    B, S = 2, 8
    VOCAB, D_BERT, HIDDEN, OUT, LAYERS = 100, 32, 16, 2, 2

    k_params, k_ids = jax.random.split(key)
    params = init_params(k_params, VOCAB, D_BERT, HIDDEN, OUT, LAYERS,
                         bidirectional=True)
    tpu_params = prepare_tpu_params(params, HIDDEN)

    input_ids = jax.random.randint(k_ids, (B, S), 0, VOCAB, dtype=jnp.int32)
    attention_mask = jnp.ones((B, S), dtype=jnp.int32)

    logits = bert_lstm_classifier_forward(tpu_params, input_ids, attention_mask)
    jax.block_until_ready(logits)
    assert logits.shape == (B, OUT)
    print("KERNEL_OK")
</pallas_src>

<mosaic_0001>
module attributes {stable_mosaic.version = 11 : i64} {
  func.func @_matmul_bias_kernel(%arg0: i32, %arg1: i32, %arg2: memref<64x32xbf16, #tpu.memory_space<vmem>>, %arg3: memref<32x256xbf16, #tpu.memory_space<vmem>>, %arg4: memref<1x256xf32, #tpu.memory_space<vmem>>, %arg5: memref<64x256xbf16, #tpu.memory_space<vmem>>) attributes {dimension_semantics = [#tpu.dimension_semantics<parallel>, #tpu.dimension_semantics<parallel>], iteration_bounds = array<i64: 1, 4>, scalar_prefetch = 0 : i64, scratch_operands = 0 : i64, tpu.core_type = #tpu.core_type<tc>, window_params = [{transform_indices = @transform_0, window_bounds = array<i64: 64, 32>}, {transform_indices = @transform_1, window_bounds = array<i64: 32, 256>}, {transform_indices = @transform_2, window_bounds = array<i64: 1, 256>}, {transform_indices = @transform_3, window_bounds = array<i64: 64, 256>}]} {
    %c0 = arith.constant 0 : index
    %c0_0 = arith.constant 0 : index
    %0 = vector.load %arg2[%c0, %c0_0] : memref<64x32xbf16, #tpu.memory_space<vmem>>, vector<64x32xbf16>
    %c0_1 = arith.constant 0 : index
    %c0_2 = arith.constant 0 : index
    %1 = vector.load %arg3[%c0_1, %c0_2] : memref<32x256xbf16, #tpu.memory_space<vmem>>, vector<32x256xbf16>
    %cst = arith.constant dense<0.000000e+00> : vector<64x256xf32>
    %2 = tpu.matmul %0, %1, %cst {dimension_numbers = #tpu.dot_dimension_numbers<[1], [0], [0], [1], [0, 0, 1, 1], [], []>} : vector<64x32xbf16>, vector<32x256xbf16>, vector<64x256xf32> -> vector<64x256xf32>
    %c0_3 = arith.constant 0 : index
    %c0_4 = arith.constant 0 : index
    %3 = vector.load %arg4[%c0_3, %c0_4] : memref<1x256xf32, #tpu.memory_space<vmem>>, vector<1x256xf32>
    %4 = vector.broadcast %3 : vector<1x256xf32> to vector<64x256xf32>
    %5 = arith.addf %2, %4 : vector<64x256xf32>
    %6 = arith.truncf %5 : vector<64x256xf32> to vector<64x256xbf16>
    %c0_5 = arith.constant 0 : index
    %c0_6 = arith.constant 0 : index
    %7 = vector.load %arg5[%c0_5, %c0_6] : memref<64x256xbf16, #tpu.memory_space<vmem>>, vector<64x256xbf16>
    tpu.vector_store %arg5[%c0_5, %c0_6], %6 {strides = array<i32>} : memref<64x256xbf16, #tpu.memory_space<vmem>>, vector<64x256xbf16>,
    return
  }
  func.func @transform_0(%arg0: i32, %arg1: i32) -> (i32, i32) {
    %c0_i32 = arith.constant 0 : i32
    %c0_i32_0 = arith.constant 0 : i32
    return %arg0, %c0_i32 : i32, i32
  }
  func.func @transform_1(%arg0: i32, %arg1: i32) -> (i32, i32) {
    %c0_i32 = arith.constant 0 : i32
    %c0_i32_0 = arith.constant 0 : i32
    return %c0_i32, %arg1 : i32, i32
  }
  func.func @transform_2(%arg0: i32, %arg1: i32) -> (i32, i32) {
    %c0_i32 = arith.constant 0 : i32
    %c0_i32_0 = arith.constant 0 : i32
    return %c0_i32, %arg1 : i32, i32
  }
  func.func @transform_3(%arg0: i32, %arg1: i32) -> (i32, i32) {
    %c0_i32 = arith.constant 0 : i32
    return %arg0, %arg1 : i32, i32
  }
}

</mosaic_0001>

<bundles_post_ra>
// kernel: tpu_custom_call.1
= control target key start
LH: loop header
LB: loop body
LE: loop exit
PB: predicated region body
PF: predicated region fallthrough
CT: control target
= control target key end

     0   :  { %8 = vsyncpa [#allocation3], 0  ;;  %s1018_s0 = inlined_call_operand.vmem [shape: bf16[64,32], index: 0, kind: input, shape index: {}]   ;;  %s1019_s1 = inlined_call_operand.hbm [shape: bf16[32,1024], index: 1, kind: input, shape index: {}]   ;;  %s1020_s2 = inlined_call_operand.vmem [shape: f32[1,1024], index: 2, kind: input, shape index: {}]   ;;  %s1021_s3 = inlined_call_operand.hbm [shape: bf16[64,1024], index: 3, kind: output, shape index: {}]  }
   0x1   :  { %10 = vsyncpa [#allocation3 + $0x1], 0 }
   0x2   :  { %11 = vsyncpa [#allocation4], 0 }
   0x3   :  { %13 = vsyncpa [#allocation4 + $0x1], 0  ;;  %s848_s12 = smov 0   ;;  %s850_s13 = smov 0  }
   0x4   :  { %s852_s14 = smov 0   ;;  %s854_s15 = smov 0  }
   0x5   :  { %s856_s16 = smov 0   ;;  %s858_s17 = smov 0  }
   0x6 LB: > { %s579_s18 = sadd.s32 4294967295, %s817_s17   ;;  %s580_s19 = sadd.s32 4294967294, %s817_s17   ;;  %s817_s17 = sphi %s858_s17, %s19_s17   ;;  %s813_s16 = sphi %s856_s16, %s1031_s16   ;;  %s809_s15 = sphi %s854_s15, %s1030_s15   ;;  %s805_s14 = sphi %s852_s14, %s1029_s14   ;;  %s801_s13 = sphi %s850_s13, %s1028_s13   ;;  %s797_s12 = sphi %s848_s12, %s1027_s12  }
   0x7   : > { %s28_s20 = sadd.s32 1, %s813_s16  ;;  %s64_s21 = sadd.s32 1, %s805_s14 }
   0x8   : > { %p29_p0 = scmp.ge.s32.totalorder %s28_s20, 4  ;;  %p71_p1 = scmp.ne.s32.totalorder %s805_s14, %s801_s13 }
   0x9   : > { %p72_p2 = scmp.eq.s32.totalorder %s817_s17, 0  ;;  %p77_p3 = scmp.ne.s32.totalorder %s801_s13, %s797_s12 }
   0xa   : > { %s1033_s20 = smov (%p29_p0, %s28_s20), 0  ;;  %p78_p5 = scmp.eq.s32.totalorder %s579_s18, 0 }
   0xb   : > { %p889_p4 = por %p72_p2, %p71_p1  ;;  %s61_s23 = ssub.s32 %s813_s16, %s1033_s20 }
   0xc   : > { %p129_p6 = scmp.eq.s32.totalorder %s579_s18, 3  ;;  %p62_p7 = scmp.eq.s32.totalorder %s61_s23, 0 }
   0xd   : > { %p895_p8 = por %p78_p5, %p77_p3  ;;  %p135_p10 = scmp.eq.s32.totalorder %s580_s19, 3 }
   0xe   : > { %p899_p9 = por %p129_p6, %p71_p1  ;;  %p642_p12 = scmp.lt.s32.totalorder %s817_s17, 4 }
   0xf   : > { %s904_s26 = scalar_select %p62_p7, %s805_s14, %s64_s21  }
  0x10   : > { %p906_p11 = por %p135_p10, %p77_p3  ;;  %s164_s28 = sand.u32 1, %s805_s14  }
  0x11   : > { %s584_s29 = sshll.u32 %s164_s28, 5  ;;  %s616_s30 = sshll.u32 %s813_s16, 7 }
  0x12   : > { %s174_s6 = scalar_lea.hbm %s1019_s1, %s616_s30  ;;  %s168_s7 = scalar_lea.vmem [#allocation2], %s584_s29 }
  0x13   : > { %s175_s8 = sshll.u32 %s168_s7, 4  ;;  %p918_p13 = pnand %p642_p12, %p889_p4  ;;  %s176_s8 = int_to_ptr.vmem [resolvable:$true] %s175_s8 }
  0x14   : > { %s165_s10 = scalar_lea.sflag [#allocation3], %s164_s28  ;;  %s722_s11 = scalar_lea.vmem %s176_s8, 512 }
  0x15   : > { %p711_p0 = pneg %p918_p13  ;;  %p723_p1 = scmp.ne.s32.totalorder %s176_s8, %s722_s11 }
  0x16   : > { %s819_s18 = smov [#allocation2]  }
  0x17   : > { %p725_p2 = pnand %p723_p1, %p711_p0  ;;  %s727_s19 = sshll.u32 %s819_s18, 4  ;;  %s728_s19 = int_to_ptr.vmem [resolvable:$false] %s727_s19 }
  0x18   : > { %s729_s21 = scalar_lea.vmem %s728_s19, 1024  ;;  %p730_p5 = scmp.lt.s32.totalorder %s176_s8, %s728_s19 }
  0x19   : > { %p726_p3 = pneg %p725_p2  ;;  %p731_p6 = scmp.lt.s32.totalorder %s729_s21, %s722_s11 }
  0x1b   : > { %p732_p7 = por %p731_p6, %p730_p5 }
  0x1d   : > { %p733_p10 = pnand %p732_p7, %p726_p3 }
  0x1f   : > { %736 = shalt.err (!%p733_p10)
}
  0x20   : > { %s820_s22 = smov 512   ;;  %s821_s23 = smov 128  }
  0x21   : > { %s822_s28 = smov 8   ;;  %p587_p4 = scmp.ge.s32.totalorder %s817_s17, 1 }
  0x22   : > { %637 = dma.hbm_to_vmem [thread:$0]  (!%p918_p13), %s174_s6, 512, %s176_s8, %s165_s10, %s820_s22, %s821_s23, %s822_s28  }
  0x23   : > { %p191_p12 = scmp.lt.s32.totalorder %s817_s17, 5 }
  0x25   : > { %p192_p0 = pnand %p587_p4, %p191_p12 }
  0x26   : > { %s929_s29 = sand.u32 (!%p192_p0), 1, %s801_s13  }
  0x27   : > { %195 = sbr.rel (%p192_p0) target bundleno = 281 (0x119), region = 32  ;;  %s588_s30 = sshll.u32 (!%p192_p0), %s929_s29, 5 }
  0x28   : > { %s198_s4 = scalar_lea.sflag (!%p192_p0), [#allocation3], %s929_s29  ;;  %s201_s5 = scalar_lea.vmem (!%p192_p0), [#allocation2], %s588_s30 }
  0x2c   : > { %788 = dma.done.wait (%p895_p8), %s198_s4, 512  }
  0x2d   : > { %790 = vsyncadd (%p895_p8), %s198_s4, 4294966784  ;;  %v823_v0 = vmov 0   ;;  %v699_v1 = vld [vmem:[%s201_s5 + $0x14] ss:$8 sps:$4 sm:$0xff]   ;;  %v701_v2 = vld [vmem:[%s201_s5 + $0x10] ss:$8 sps:$4 sm:$0xff]   ;;  %v262_v9 = vlaneseq }
  0x2e   : > { %357 = vmatprep.mubr.bf16.mxu0 %v823_v0  ;;  %377 = vmatprep.mubr.bf16.mxu1 %v823_v0  ;;  %v702_v3 = vld [vmem:[%s201_s5 + $0x4] ss:$8 sps:$4 sm:$0xff]   ;;  %v704_v4 = vld [vmem:[%s201_s5] ss:$8 sps:$4 sm:$0xff]   ;;  %v706_v6 = vld [vmem:[%s1018_s0 + $0x10] sm:$0xff]   ;;  %vm312_vm0 = vcmask 261120  }
  0x2f   : > { %337 = vmatprep.subr.bf16.mxu0 %v699_v1  ;;  %626 = vmatprep.subr.bf16.mxu1 %v699_v1  ;;  %v705_v5 = vld [vmem:[%s1018_s0] sm:$0xff]   ;;  %v707_v7 = vld [vmem:[%s1018_s0 + $0x8] sm:$0xff]   ;;  %v708_v8 = vld [vmem:[%s1018_s0 + $0x18] sm:$0xff]   ;;  %s590_s19 = sshll.u32 %s809_s15, 1  ;;  %v263_v10 = vshrl.u32 %v262_v9, 7  ;;  %s589_s28 = sshll.u32 %s929_s29, 6 }
  0x30   : > { %338 = vmatpush1.bf16.msra.mxu0 %v701_v2  ;;  %628 = vmatpush1.bf16.msra.mxu1 %v701_v2  ;;  %p241_p8 = scmp.lt.s32.totalorder %s590_s19, 7  ;;  %s954_s30 = scalar_lea.vmem [#allocation5], %s589_s28 }
  0x31   : > { %339 = vmatprep.subr.bf16.mxu0 %v702_v3  ;;  %627 = vmatprep.subr.bf16.mxu1 %v702_v3  ;;  %v264_v11 = vsub.s32 0, %v263_v10  ;;  %v268_v12 = vsub.s32 1, %v263_v10  ;;  %s471_s4 = sshll.u32 %s954_s30, 4  ;;  %s625_s5 = sshll.u32 %s809_s15, 7  ;;  %s962_s4 = int_to_ptr.vmem [resolvable:$true] %s471_s4 }
  0x32   : > { %s1035_s19 = smov (!%p241_p8, %s590_s19), 7  ;;  %s969_s24 = scalar_lea.hbm %s1021_s3, %s625_s5 }
  0x33   : > { %s243_s23 = scalar_lea.vmem %s1020_s2, %s1035_s19  ;;  %s455_s15 = scalar_lea.sflag [#allocation4], %s929_s29 }
  0x34   : > { %340 = vmatpush1.bf16.msra.mxu0 %v704_v4  ;;  %629 = vmatpush1.bf16.msra.mxu1 %v704_v4  ;;  %v260_v13 = vld [vmem:[%s243_s23] sm:$0x3]  ;;  %s737_s8 = scalar_lea.vmem %s962_s4, 1024  ;;  %s824_s9 = smov [#allocation5]  }
  0x35   : > { %v265_v14 = vrot.slane %v260_v13, %v264_v11  ;;  %v269_v15 = vrot.slane %v260_v13, %v268_v12  ;;  %p738_p13 = scmp.ne.s32.totalorder %s962_s4, %s737_s8  ;;  %s741_s10 = sshll.u32 %s824_s9, 4  ;;  %s742_s10 = int_to_ptr.vmem [resolvable:$false] %s741_s10 }
  0x36   : > { %s743_s11 = scalar_lea.vmem %s742_s10, 2048  ;;  %p744_p3 = scmp.lt.s32.totalorder %s962_s4, %s742_s10 }
  0x37   : > { %599 = vmatmul.mubr.msk.bf16.vlgmr.msra.gmra.mxu0 %vm312_vm0, %v705_v5  ;;  %601 = vmatmul.mubr.msk.bf16.vlgmr.msra.gmra.mxu1 %vm312_vm0, %v706_v6  ;;  %p739_p1 = pnand %p738_p13, %p899_p9  ;;  %p745_p5 = scmp.lt.s32.totalorder %s743_s11, %s737_s8 }
  0x38   : > { %367 = vmatprep.mubr.bf16.mxu0 %v823_v0  ;;  %387 = vmatprep.mubr.bf16.mxu1 %v823_v0 }
  0x39   : > { %p740_p2 = pneg %p739_p1  ;;  %p746_p6 = por %p745_p5, %p744_p3 }
  0x3b   : > { %p747_p7 = pnand %p746_p6, %p740_p2 }
  0x3f   : > { %600 = vmatmul.mubr.msk.bf16.gmra.mxu0 %vm312_vm0, %v707_v7  ;;  %602 = vmatmul.mubr.msk.bf16.gmra.mxu1 %vm312_vm0, %v708_v8 }
  0xf7   : > { %v359_v16 = vpop.f32.mrf.mxu0  ;;  %v379_v17 = vpop.f32.mrf.mxu1 }
  0xf8   : > { %v360_v20 = vadd.f32 %v359_v16, %v265_v14  ;;  %v380_v21 = vadd.f32 %v379_v17, %v265_v14 }
  0xf9   : > { %v361_v18 = vpop.f32.mrf.mxu0  ;;  %v381_v19 = vpop.f32.mrf.mxu1 }
  0xfa   : > { %v362_v22 = vadd.f32 %v361_v18, %v269_v15  ;;  %v382_v23 = vadd.f32 %v381_v19, %v269_v15 }
  0xfb   : > { %v363_v24 = vpop.f32.mrf.mxu0  ;;  %v383_v25 = vpop.f32.mrf.mxu1 }
  0xfc   : > { %v617_v26 = vpack.c.bf16 %v362_v22, %v360_v20  ;;  %v621_v27 = vpack.c.bf16 %v382_v23, %v380_v21  ;;  %v364_v30 = vadd.f32 %v363_v24, %v265_v14  ;;  %v384_v31 = vadd.f32 %v383_v25, %v265_v14 }
  0xfd   : > { %v365_v28 = vpop.f32.mrf.mxu0  ;;  %v385_v29 = vpop.f32.mrf.mxu1 }
  0xfe   : > { %446 = vst [vmem:[%s954_s30] sm:$0xff] %v617_v26  ;;  %450 = vst [vmem:[%s954_s30 + $0x20] sm:$0xff] %v621_v27  ;;  %v366_v32 = vadd.f32 %v365_v28, %v269_v15  ;;  %v386_v33 = vadd.f32 %v385_v29, %v269_v15 }
  0xff   : > { %v369_v34 = vpop.f32.mrf.mxu0  ;;  %v389_v35 = vpop.f32.mrf.mxu1 }
 0x100   : > { %v618_v36 = vpack.c.bf16 %v366_v32, %v364_v30  ;;  %v622_v37 = vpack.c.bf16 %v386_v33, %v384_v31  ;;  %v370_v40 = vadd.f32 %v369_v34, %v265_v14  ;;  %v390_v41 = vadd.f32 %v389_v35, %v265_v14 }
 0x101   : > { %v371_v38 = vpop.f32.mrf.mxu0  ;;  %v391_v39 = vpop.f32.mrf.mxu1 }
 0x102   : > { %447 = vst [vmem:[%s954_s30 + $0x8] sm:$0xff] %v618_v36  ;;  %451 = vst [vmem:[%s954_s30 + $0x28] sm:$0xff] %v622_v37  ;;  %v372_v42 = vadd.f32 %v371_v38, %v269_v15  ;;  %v392_v43 = vadd.f32 %v391_v39, %v269_v15 }
 0x103   : > { %v373_v44 = vpop.f32.mrf.mxu0  ;;  %v393_v45 = vpop.f32.mrf.mxu1 }
 0x104   : > { %v619_v46 = vpack.c.bf16 %v372_v42, %v370_v40  ;;  %v623_v47 = vpack.c.bf16 %v392_v43, %v390_v41  ;;  %v374_v50 = vadd.f32 %v373_v44, %v265_v14  ;;  %v394_v51 = vadd.f32 %v393_v45, %v265_v14 }
 0x105   : > { %v375_v48 = vpop.f32.mrf.mxu0  ;;  %v395_v49 = vpop.f32.mrf.mxu1 }
 0x106   : > { %448 = vst [vmem:[%s954_s30 + $0x10] sm:$0xff] %v619_v46  ;;  %452 = vst [vmem:[%s954_s30 + $0x30] sm:$0xff] %v623_v47  ;;  %v376_v52 = vadd.f32 %v375_v48, %v269_v15  ;;  %v396_v53 = vadd.f32 %v395_v49, %v269_v15 }
 0x108   : > { %v620_v54 = vpack.c.bf16 %v376_v52, %v374_v50  ;;  %v624_v55 = vpack.c.bf16 %v396_v53, %v394_v51 }
 0x10a   : > { %449 = vst [vmem:[%s954_s30 + $0x18] sm:$0xff] %v620_v54  ;;  %453 = vst [vmem:[%s954_s30 + $0x38] sm:$0xff] %v624_v55 }
 0x10b   : > { %750 = shalt.err (!%p747_p7)
}
 0x10c   : > { %s751_s18 = scalar_lea.hbm %s969_s24, 1024  ;;  %s755_s22 = scalar_lea.hbm %s1021_s3, 4096 }
 0x10d   : > { %p752_p10 = scmp.ne.s32.totalorder %s969_s24, %s751_s18  ;;  %p756_p0 = scmp.lt.s32.totalorder %s969_s24, %s1021_s3 }
 0x10e   : > { %p757_p8 = scmp.lt.s32.totalorder %s755_s22, %s751_s18 }
 0x10f   : > { %p753_p4 = pnand %p752_p10, %p899_p9 }
 0x110   : > { %p758_p13 = por %p757_p8, %p756_p0 }
 0x111   : > { %p754_p12 = pneg %p753_p4 }
 0x113   : > { %p759_p1 = pnand %p758_p13, %p754_p12 }
 0x115   : > { %762 = shalt.err (!%p759_p1)
}
 0x116   : > { %s825_s30 = smov 128   ;;  %s826_s5 = smov 512  }
 0x117   : > { %s827_s6 = smov 8  }
 0x118   : > { %632 = dma.vmem_to_hbm [thread:$0]  (%p899_p9), %s962_s4, 1024, %s969_s24, %s455_s15, %s825_s30, %s826_s5, %s827_s6  }
 0x119 PF: > { %p643_p2 = scmp.ge.s32.totalorder %s817_s17, 2  ;;  %s486_s7 = sand.u32 1, %s797_s12  }
 0x11a   : > { %s487_s8 = scalar_lea.sflag [#allocation4], %s486_s7 }
 0x11b   : > { %p639_p3 = pnand %p643_p2, %p906_p11 }
 0x11d   : > { %p640_p5 = pneg %p639_p3 }
 0x11f   : > { %792 = dma.done.wait (%p640_p5), %s487_s8, 1024  }
 0x120   : > { %794 = vsyncadd (%p640_p5), %s487_s8, 4294966272  ;;  %s19_s17 = sadd.s32 1, %s817_s17   ;;  %s1027_s12 = smov %s801_s13 }
 0x121   : > { %p16_p6 = scmp.ge.s32.totalorder %s19_s17, 6   ;;  %s1028_s13 = smov %s805_s14 }
 0x122   : > { %s1029_s14 = smov %s904_s26  ;;  %s1030_s15 = smov %s813_s16 }
 0x123   : > { %s1031_s16 = smov %s1033_s20  ;;  %18 = sbr.rel (!%p16_p6) target bundleno = 6 (0x6), region = 83 }
 0x128   :  { %492 = vsyncpa [#allocation3], 1 }
 0x129   :  { %494 = vsyncpa [#allocation3 + $0x1], 1 }
 0x12a   :  { %495 = vsyncpa [#allocation4], 1 }
 0x12b   :  { %497 = vsyncpa [#allocation4 + $0x1], 1 }

</bundles_post_ra>
